<compile_context>
chip_gen: v5e
topology: v5e:2x2
jax: 0.10.0
libtpu: 0.0.40
codegen_flags: <defaults>
</compile_context>

<pallas_src>
import functools

import jax
import jax.numpy as jnp
from jax import lax
from jax.experimental import pallas as pl
from jax.experimental.pallas import tpu as pltpu


# ---------------------------------------------------------------------------
# helpers
# ---------------------------------------------------------------------------

def _round_up(x, m):
    return ((x + m - 1) // m) * m


def _pick_tile(padded_dim, candidates):
    """Largest candidate that evenly divides padded_dim (smallest always does)."""
    for c in candidates:
        if padded_dim % c == 0:
            return c
    return padded_dim


def _pad2d(a, rows, cols):
    r, c = a.shape
    if r == rows and c == cols:
        return a
    return jnp.pad(a, ((0, rows - r), (0, cols - c)))


def _apply_activation(h, activation):
    if activation is None:
        return h
    if activation == "relu":
        return jnp.maximum(h, 0.0)
    if activation == "tanh":
        return jnp.tanh(h)
    if activation == "sigmoid":
        return jax.nn.sigmoid(h)
    if activation == "softplus":
        return jax.nn.softplus(h)
    raise ValueError(f"unsupported activation: {activation}")


def _dot_xwT(x, w):
    # x: (m, k), w: (n, k)  ->  (m, n) == x @ w.T, f32 accumulate on the MXU.
    return lax.dot_general(
        x, w,
        dimension_numbers=(((1,), (1,)), ((), ())),
        preferred_element_type=jnp.float32,
    )


# ---------------------------------------------------------------------------
# kernels
# ---------------------------------------------------------------------------

def _make_single_block_kernel(activation, use_bias):
    """Whole-problem kernel: one shot, no grid, operands fully resident in VMEM."""

    def kernel(*refs):
        if use_bias:
            x_ref, w_ref, b_ref, o_ref = refs
        else:
            x_ref, w_ref, o_ref = refs
            b_ref = None
        h = _dot_xwT(x_ref[...], w_ref[...])
        if use_bias:
            h = h + b_ref[...].astype(jnp.float32)
        h = _apply_activation(h, activation)
        o_ref[...] = h.astype(o_ref.dtype)

    return kernel


def _make_tiled_kernel(activation, use_bias):
    """(M, N, K)-tiled kernel with a resident f32 accumulator over the K axis."""

    def kernel(*refs):
        if use_bias:
            x_ref, w_ref, b_ref, o_ref, acc_ref = refs
        else:
            x_ref, w_ref, o_ref, acc_ref = refs
            b_ref = None

        k = pl.program_id(2)

        @pl.when(k == 0)
        def _init():
            acc_ref[...] = jnp.zeros_like(acc_ref)

        acc_ref[...] += _dot_xwT(x_ref[...], w_ref[...])

        @pl.when(k == pl.num_programs(2) - 1)
        def _finalize():
            h = acc_ref[...]
            if use_bias:
                h = h + b_ref[...].astype(jnp.float32)
            h = _apply_activation(h, activation)
            o_ref[...] = h.astype(o_ref.dtype)

    return kernel


# ---------------------------------------------------------------------------
# wrapper
# ---------------------------------------------------------------------------

def nonlinear_forward(x, weight, bias=None, activation=None,
                      tile_m=None, tile_n=None, tile_k=None):
    """Pallas equivalent of NonLinear.forward.

    x:      (B, D_in)        float32
    weight: (D_out, D_in)    float32  (PyTorch nn.Linear layout — NOT transposed)
    bias:   (D_out,) or None float32
    activation: None | "relu" | "tanh" | "sigmoid" | "softplus"
    tile_*: optional tile-size overrides (tile_m % 8 == 0, tile_n/k % 128 == 0)
    """
    B, D_in = x.shape
    D_out, D_in_w = weight.shape
    assert D_in == D_in_w, "weight / input feature mismatch"
    use_bias = bias is not None

    # Pad to hardware-friendly shapes: sublane multiple of 8, lane multiple of 128.
    Mp0 = _round_up(B, 8)
    Kp0 = _round_up(D_in, 128)
    Np0 = _round_up(D_out, 128)

    # Tile sizes (modest caps keep VMEM well under the 32 MiB default scoped
    # limit on v6e/v7x even with double buffering; all are MXU-friendly).
    tm = tile_m if tile_m is not None else _pick_tile(Mp0, (512, 256, 128, 64, 32, 16, 8))
    tn = tile_n if tile_n is not None else _pick_tile(Np0, (512, 384, 256, 128))
    tk = tile_k if tile_k is not None else _pick_tile(Kp0, (512, 384, 256, 128))
    assert tm % 8 == 0 and tn % 128 == 0 and tk % 128 == 0

    Mp = _round_up(Mp0, tm)
    Np = _round_up(Np0, tn)
    Kp = _round_up(Kp0, tk)

    x_p = _pad2d(x, Mp, Kp)
    w_p = _pad2d(weight, Np, Kp)
    operands = [x_p, w_p]
    if use_bias:
        operands.append(_pad2d(bias.reshape(1, D_out), 1, Np))

    grid = (Mp // tm, Np // tn, Kp // tk)

    if grid == (1, 1, 1):
        # Tiny problem: single shot, everything resident in VMEM, no pipeline
        # prologue/epilogue and no double-buffered copies of the operands.
        kernel = _make_single_block_kernel(activation, use_bias)
        vmem = pl.BlockSpec(memory_space=pltpu.MemorySpace.VMEM)
        out_p = pl.pallas_call(
            kernel,
            out_shape=jax.ShapeDtypeStruct((Mp, Np), x.dtype),
            in_specs=[vmem] * len(operands),
            out_specs=pl.BlockSpec(memory_space=pltpu.MemorySpace.VMEM),
        )(*operands)
    else:
        # Real layer sizes: M/N/K-tiled, K innermost with a resident accumulator.
        kernel = _make_tiled_kernel(activation, use_bias)
        in_specs = [
            pl.BlockSpec((tm, tk), lambda i, j, k: (i, k)),   # x tile
            pl.BlockSpec((tn, tk), lambda i, j, k: (j, k)),   # weight tile (D_out, D_in)
        ]
        if use_bias:
            in_specs.append(pl.BlockSpec((1, tn), lambda i, j, k: (0, j)))
        out_p = pl.pallas_call(
            kernel,
            out_shape=jax.ShapeDtypeStruct((Mp, Np), x.dtype),
            grid_spec=pltpu.PrefetchScalarGridSpec(
                num_scalar_prefetch=0,
                grid=grid,
                in_specs=in_specs,
                out_specs=pl.BlockSpec((tm, tn), lambda i, j, k: (i, j)),
                scratch_shapes=[pltpu.VMEM((tm, tn), jnp.float32)],
            ),
            compiler_params=pltpu.CompilerParams(
                dimension_semantics=("parallel", "parallel", "arbitrary"),
            ),
        )(*operands)

    if Mp != B or Np != D_out:
        out_p = out_p[:B, :D_out]
    return out_p


def init_linear_params(key, input_size, output_size, bias=True):
    """Deterministic init mimicking torch.nn.Linear default U[-1/sqrt(in), 1/sqrt(in)]."""
    kw, kb = jax.random.split(key)
    bound = 1.0 / (input_size ** 0.5)
    weight = jax.random.uniform(
        kw, (output_size, input_size), jnp.float32, minval=-bound, maxval=bound
    )
    b = (
        jax.random.uniform(kb, (output_size,), jnp.float32, minval=-bound, maxval=bound)
        if bias
        else None
    )
    return weight, b


# ---------------------------------------------------------------------------
# self-test
# ---------------------------------------------------------------------------

def _ref(x, weight, bias, activation):
    h = jnp.dot(x, weight.T, precision=lax.Precision.HIGHEST)
    if bias is not None:
        h = h + bias
    return _apply_activation(h, activation)


if __name__ == "__main__":
    key = jax.random.PRNGKey(0)
    k_x1, k_p1, k_x2, k_p2, k_x3, k_p3 = jax.random.split(key, 6)

    atol, rtol = 1e-4, 1e-4
    ok = True

    # --- case 1: tiny layer (single-block / no-grid path), relu + identity ---
    B, D_in, D_out = 8, 32, 64
    x1 = jax.random.normal(k_x1, (B, D_in), jnp.float32)
    w1, b1 = init_linear_params(k_p1, D_in, D_out, bias=True)

    out_act = nonlinear_forward(x1, w1, b1, activation="relu")
    out_lin = nonlinear_forward(x1, w1, b1, activation=None)
    jax.block_until_ready(out_act)
    jax.block_until_ready(out_lin)
    ok &= bool(jnp.allclose(out_act, _ref(x1, w1, b1, "relu"), atol=atol, rtol=rtol))
    ok &= bool(jnp.allclose(out_lin, _ref(x1, w1, b1, None), atol=atol, rtol=rtol))

    # --- case 2: no-bias layer (bias operand omitted entirely) ---------------
    w2, _ = init_linear_params(k_p2, D_in, D_out, bias=False)
    x2 = jax.random.normal(k_x2, (B, D_in), jnp.float32)
    out_nb = nonlinear_forward(x2, w2, None, activation="tanh")
    jax.block_until_ready(out_nb)
    ok &= bool(jnp.allclose(out_nb, _ref(x2, w2, None, "tanh"), atol=atol, rtol=rtol))

    # --- case 3: force the tiled / accumulator path on a modest shape --------
    B3, D_in3, D_out3 = 16, 256, 256
    x3 = jax.random.normal(k_x3, (B3, D_in3), jnp.float32)
    w3, b3 = init_linear_params(k_p3, D_in3, D_out3, bias=True)
    out_tiled = nonlinear_forward(
        x3, w3, b3, activation="sigmoid", tile_m=8, tile_n=128, tile_k=128
    )  # grid = (2, 2, 2) — exercises init/accumulate/finalize via pl.when
    jax.block_until_ready(out_tiled)
    ok &= bool(jnp.allclose(out_tiled, _ref(x3, w3, b3, "sigmoid"), atol=atol, rtol=rtol))

    assert ok, "Pallas NonLinear output mismatch vs reference"
    print("KERNEL_OK")
</pallas_src>

<mosaic_0001>
module attributes {stable_mosaic.version = 11 : i64} {
  func.func @kernel(%arg0: memref<8x128xf32, #tpu.memory_space<vmem>>, %arg1: memref<128x128xf32, #tpu.memory_space<vmem>>, %arg2: memref<1x128xf32, #tpu.memory_space<vmem>>, %arg3: memref<8x128xf32, #tpu.memory_space<vmem>>) attributes {dimension_semantics = [], scalar_prefetch = 0 : i64, scratch_operands = 0 : i64, tpu.core_type = #tpu.core_type<tc>} {
    %c0 = arith.constant 0 : index
    %c0_0 = arith.constant 0 : index
    %0 = vector.load %arg0[%c0, %c0_0] : memref<8x128xf32, #tpu.memory_space<vmem>>, vector<8x128xf32>
    %c0_1 = arith.constant 0 : index
    %c0_2 = arith.constant 0 : index
    %1 = vector.load %arg1[%c0_1, %c0_2] : memref<128x128xf32, #tpu.memory_space<vmem>>, vector<128x128xf32>
    %cst = arith.constant dense<0.000000e+00> : vector<8x128xf32>
    %2 = tpu.matmul %0, %1, %cst {dimension_numbers = #tpu.dot_dimension_numbers<[1], [1], [0], [0], [0, 0, 1, 0], [], []>} : vector<8x128xf32>, vector<128x128xf32>, vector<8x128xf32> -> vector<8x128xf32>
    %c0_3 = arith.constant 0 : index
    %c0_4 = arith.constant 0 : index
    %3 = vector.load %arg2[%c0_3, %c0_4] : memref<1x128xf32, #tpu.memory_space<vmem>>, vector<1x128xf32>
    %4 = vector.broadcast %3 : vector<1x128xf32> to vector<8x128xf32>
    %5 = arith.addf %2, %4 : vector<8x128xf32>
    %cst_5 = arith.constant 0.000000e+00 : f32
    %6 = vector.broadcast %cst_5 : f32 to vector<8x128xf32>
    %7 = arith.maximumf %5, %6 : vector<8x128xf32>
    %c0_6 = arith.constant 0 : index
    %c0_7 = arith.constant 0 : index
    %8 = vector.load %arg3[%c0_6, %c0_7] : memref<8x128xf32, #tpu.memory_space<vmem>>, vector<8x128xf32>
    tpu.vector_store %arg3[%c0_6, %c0_7], %7 {strides = array<i32>} : memref<8x128xf32, #tpu.memory_space<vmem>>, vector<8x128xf32>,
    return
  }
}

</mosaic_0001>

<bundles_post_ra>
// kernel: tpu_custom_call.1
= control target key start
LH: loop header
LB: loop body
LE: loop exit
PB: predicated region body
PF: predicated region fallthrough
CT: control target
= control target key end

     0   :  { %8 = vsyncpa [#allocation3], 0  ;;  %s227_s0 = inlined_call_operand.hbm [shape: f32[8,128], index: 0, kind: input, shape index: {}]   ;;  %s228_s1 = inlined_call_operand.hbm [shape: f32[128,128], index: 1, kind: input, shape index: {}]   ;;  %s229_s2 = inlined_call_operand.vmem [shape: f32[1,128], index: 2, kind: input, shape index: {}]   ;;  %s230_s3 = inlined_call_operand.hbm [shape: f32[8,128], index: 3, kind: output, shape index: {}]  }
   0x1   :  { %9 = vsyncpa [#allocation6], 0 }
   0x2   :  { %10 = vsyncpa [#allocation4], 0  ;;  %s16_s14 = sshll.u32 %s227_s0, 4  ;;  %s190_s15 = smov [#allocation2]   ;;  %s17_s14 = int_to_ptr.hbm [resolvable:$true] %s16_s14 }
   0x3   :  { %s18_s16 = sshll.u32 %s190_s15, 4  ;;  %s26_s19 = sshll.u32 %s228_s1, 4  ;;  %s19_s16 = int_to_ptr.vmem [resolvable:$true] %s18_s16  ;;  %s27_s19 = int_to_ptr.hbm [resolvable:$true] %s26_s19 }
   0x4   :  { %21 = dma.hbm_to_vmem [thread:$0]  %s17_s14, 128, %s19_s16, [#allocation3]  }
   0x5   :  { %s191_s20 = smov [#allocation5]   ;;  %s192_s22 = smov 128  }
   0x6   :  { %s28_s21 = sshll.u32 %s191_s20, 4  ;;  %s193_s23 = smov 8   ;;  %s29_s21 = int_to_ptr.vmem [resolvable:$true] %s28_s21 }
   0x7   :  { %34 = dma.hbm_to_vmem [thread:$0]  %s27_s19, 2048, %s29_s21, [#allocation6], %s192_s22, %s192_s22, %s193_s23  }
   0x8   :  { %184 = dma.done.wait [#allocation3], 128  }
   0x9   :  { %185 = vsyncadd [#allocation3], 4294967168 }
   0xa   :  { %186 = dma.done.wait [#allocation6], 2048  }
   0xb   :  { %187 = vsyncadd [#allocation6], 4294965248  ;;  %v61_v0 = vld [vmem:[#allocation5 + $0x78] sm:$0xff]  ;;  %v60_v1 = vld [vmem:[#allocation5 + $0x70] sm:$0xff]  ;;  %s194_s24 = smov [#allocation7]   ;;  %s95_s28 = sshll.u32 %s230_s3, 4  ;;  %s96_s28 = int_to_ptr.hbm [resolvable:$true] %s95_s28 }
   0xc   :  { %66 = vmatpush.xpose.msra.mxu0 %v61_v0  ;;  %v59_v2 = vld [vmem:[#allocation5 + $0x68] sm:$0xff]  ;;  %v58_v3 = vld [vmem:[#allocation5 + $0x60] sm:$0xff]  ;;  %v57_v4 = vld [vmem:[#allocation5 + $0x58] sm:$0xff]  ;;  %s93_s25 = sshll.u32 %s194_s24, 4  ;;  %s94_s25 = int_to_ptr.vmem [resolvable:$true] %s93_s25 }
   0xd   :  { %v56_v5 = vld [vmem:[#allocation5 + $0x50] sm:$0xff]  ;;  %v55_v6 = vld [vmem:[#allocation5 + $0x48] sm:$0xff]  ;;  %v54_v7 = vld [vmem:[#allocation5 + $0x40] sm:$0xff] }
   0xe   :  { %v53_v8 = vld [vmem:[#allocation5 + $0x38] sm:$0xff]  ;;  %v52_v9 = vld [vmem:[#allocation5 + $0x30] sm:$0xff]  ;;  %v51_v10 = vld [vmem:[#allocation5 + $0x28] sm:$0xff] }
   0xf   :  { %v50_v11 = vld [vmem:[#allocation5 + $0x20] sm:$0xff]  ;;  %v49_v12 = vld [vmem:[#allocation5 + $0x18] sm:$0xff]  ;;  %v48_v13 = vld [vmem:[#allocation5 + $0x10] sm:$0xff] }
  0x10   :  { %67 = vmatpush.xpose.msra.mxu0 %v60_v1  ;;  %v47_v14 = vld [vmem:[#allocation5 + $0x8] sm:$0xff]  ;;  %v46_v15 = vld [vmem:[#allocation5] sm:$0xff]  ;;  %v45_v16 = vld [vmem:[#allocation2] sm:$0xff] }
  0x11   :  { %v111_v17 = vld [vmem:[%s229_s2] ss:$0 sm:$0xff] }
  0x14   :  { %68 = vmatpush.xpose.msra.mxu0 %v59_v2 }
  0x18   :  { %69 = vmatpush.xpose.msra.mxu0 %v58_v3 }
  0x1c   :  { %70 = vmatpush.xpose.msra.mxu0 %v57_v4 }
  0x20   :  { %71 = vmatpush.xpose.msra.mxu0 %v56_v5 }
  0x24   :  { %72 = vmatpush.xpose.msra.mxu0 %v55_v6 }
  0x28   :  { %73 = vmatpush.xpose.msra.mxu0 %v54_v7 }
  0x2c   :  { %74 = vmatpush.xpose.msra.mxu0 %v53_v8 }
  0x30   :  { %75 = vmatpush.xpose.msra.mxu0 %v52_v9 }
  0x34   :  { %76 = vmatpush.xpose.msra.mxu0 %v51_v10 }
  0x38   :  { %77 = vmatpush.xpose.msra.mxu0 %v50_v11 }
  0x3c   :  { %78 = vmatpush.xpose.msra.mxu0 %v49_v12 }
  0x40   :  { %79 = vmatpush.xpose.msra.mxu0 %v48_v13 }
  0x44   :  { %80 = vmatpush.xpose.msra.mxu0 %v47_v14 }
  0x48   :  { %81 = vmatpush.xpose.msra.mxu0 %v46_v15 }
  0x4b   :  { %82 = vmatmul.f32.vlgmr.msra.gmra.mxu0 %v45_v16 }
  0xc8   :  { %v83_v18 = vpop.f32.mrf.mxu0 }
  0xc9   :  { %v84_v19 = vadd.f32 %v111_v17, %v83_v18 }
  0xcb   :  { %v86_v20 = vmax.f32 %v84_v19, 0.0 }
  0xcd   :  { %87 = vst [vmem:[#allocation7] sm:$0xff] %v86_v20 }
  0xce   :  { %98 = dma.vmem_to_hbm [thread:$0]  %s94_s25, 128, %s96_s28, [#allocation4]  }
  0xcf   :  { %188 = dma.done.wait [#allocation4], 128  }
  0xd0   :  { %189 = vsyncadd [#allocation4], 4294967168 }
  0xd1   :  { %103 = vsyncpa [#allocation3], 1 }
  0xd2   :  { %104 = vsyncpa [#allocation6], 1 }
  0xd3   :  { %105 = vsyncpa [#allocation4], 1 }

</bundles_post_ra>
